<compile_context>
chip_gen: v6e
topology: v6e:2x2x1
jax: 0.10.0
libtpu: 0.0.40
codegen_flags: <defaults>
</compile_context>

<pallas_src>
import functools

import jax
import jax.numpy as jnp
from jax.experimental import pallas as pl
from jax.experimental.pallas import tpu as pltpu

_EPS = 1e-5
_N_PAR = 2   # leading "parallel" split of the stats pass (2 TensorCores on v7x)
_SUB = 8     # sublane group; stats partials live in (8, H) row blocks


def _round_up(a, b):
    return ((a + b - 1) // b) * b


def _vmem_budget_bytes():
    """Per-generation VMEM budget for tiles + resident weights."""
    try:
        kind = jax.devices()[0].device_kind.lower()
    except Exception:
        kind = ""
    if "v7" in kind:
        return 44 * 1024 * 1024          # 64 MiB physical per TC -> keep headroom
    if "v5" in kind or "v6" in kind:
        return 96 * 1024 * 1024          # 128 MiB physical VMEM
    return 44 * 1024 * 1024              # unknown chip -> conservative


def _tile_m_cap(D, H, O, out_bytes, budget):
    """Largest tile_m (multiple of 8) whose pass-B working set fits `budget`."""
    # VMEM-resident (conservatively assume double-buffered) bf16 weights plus
    # the small f32 stats/BN vectors.
    fixed = 2 * (D * H * 2 + H * O * 2)
    fixed += 2 * (2 * _N_PAR * _SUB * H * 4 + 2 * H * 4 + O * 4)
    # Streaming + temporary bytes per M row: double-buffered f32 x tile,
    # double-buffered out tile, f32 h and bf16 post-ReLU h temporaries.
    per_row = 2 * D * 4 + 2 * O * out_bytes + H * 4 + H * 2
    cap = max(budget - fixed, per_row) // per_row
    return max(_SUB, min((int(cap) // _SUB) * _SUB, 2048))


def _stats_kernel(x_ref, w1_ref, sum_ref, sq_ref):
    """Per-group partial per-feature sum / sum-of-squares of h = x @ W1."""

    # Zero this group's resident (8, H) accumulators on its first M tile.
    @pl.when(pl.program_id(1) == 0)
    def _():
        sum_ref[...] = jnp.zeros_like(sum_ref)
        sq_ref[...] = jnp.zeros_like(sq_ref)

    # bf16 only at the MXU inputs (cast in-kernel); statistics stay f32.
    h = jnp.dot(x_ref[...].astype(jnp.bfloat16), w1_ref[...],
                preferred_element_type=jnp.float32)
    sum_ref[0:1, :] = sum_ref[0:1, :] + jnp.sum(h, axis=0, keepdims=True)
    sq_ref[0:1, :] = sq_ref[0:1, :] + jnp.sum(h * h, axis=0, keepdims=True)


def _apply_kernel(x_ref, w1_ref, sum_ref, sq_ref, gamma_ref, beta_ref,
                  w2_ref, b2_ref, o_ref, *, inv_m):
    # Merge the per-group stats partials and fold BatchNorm into one
    # scale/shift FMA.  O(H) VPU work + one EUP rsqrt per tile: hidden under
    # the MXU, and it removes the standalone XLA epilogue ops entirely.
    col_sum = jnp.sum(sum_ref[...], axis=0, keepdims=True)
    col_sq = jnp.sum(sq_ref[...], axis=0, keepdims=True)
    mean = col_sum * inv_m
    var = jnp.maximum(col_sq * inv_m - mean * mean, 0.0)    # biased variance
    scale = gamma_ref[...] * jax.lax.rsqrt(var + _EPS)
    shift = beta_ref[...] - mean * scale

    # Recompute h = x_tile @ W1 (keeps VMEM bounded in M; no (M, H) HBM temp).
    h = jnp.dot(x_ref[...].astype(jnp.bfloat16), w1_ref[...],
                preferred_element_type=jnp.float32)
    h = jnp.maximum(h * scale + shift, 0.0)                 # BN + ReLU, f32
    y = jnp.dot(h.astype(w2_ref.dtype), w2_ref[...],
                preferred_element_type=jnp.float32)
    o_ref[...] = (y + b2_ref[...]).astype(o_ref.dtype)


@functools.partial(jax.jit, static_argnames=("tile_m", "out_dtype"))
def mlp_forward(x, w1_t, gamma, beta, w2_t, b2, *, tile_m=None, out_dtype=None):
    """x: (B, N, D) f32.  w1_t: (D, H), w2_t: (H, O), gamma/beta: (1, H), b2: (1, O)."""
    B, N, D = x.shape
    H = w1_t.shape[1]
    O = w2_t.shape[1]
    M = B * N

    out_dt = jnp.dtype(x.dtype if out_dtype is None else out_dtype)
    out_bytes = out_dt.itemsize

    # Tile-size selection: honor the request but stay inside the per-chip
    # VMEM budget, and never allocate more than one parallel group's rows.
    budget = _vmem_budget_bytes()
    req = _round_up(max(tile_m or 1024, _SUB), _SUB)
    cap = _tile_m_cap(D, H, O, out_bytes, budget)
    tile_m = min(req, cap, _round_up((M + _N_PAR - 1) // _N_PAR, _SUB))

    # Pad M so both parallel groups get the same whole number of tiles
    # (balanced v7x cores, even n_tiles).  Zero rows add exactly 0 to the BN
    # sums; the true M is used as the divisor.
    m_pad = _round_up(M, _N_PAR * tile_m)
    n_tiles = m_pad // tile_m
    tiles_per_core = n_tiles // _N_PAR

    x2d = x.reshape(M, D)
    if m_pad != M:
        x2d = jnp.pad(x2d, ((0, m_pad - M), (0, 0)))

    # Weights in bf16 (tiny one-time cast, halves their VMEM footprint);
    # x stays f32 in HBM and is cast in-kernel.
    w1_bf = w1_t.astype(jnp.bfloat16)
    w2_bf = w2_t.astype(jnp.bfloat16)

    vmem_limit = budget + 12 * 1024 * 1024
    params_a = pltpu.CompilerParams(
        dimension_semantics=("parallel", "arbitrary"),
        vmem_limit_bytes=vmem_limit)
    params_b = pltpu.CompilerParams(
        dimension_semantics=("parallel",),
        vmem_limit_bytes=vmem_limit)

    # ------- pass A: per-group partial sum / sum-of-squares of x @ W1 -------
    col_sum, col_sq = pl.pallas_call(
        _stats_kernel,
        out_shape=(jax.ShapeDtypeStruct((_N_PAR * _SUB, H), jnp.float32),
                   jax.ShapeDtypeStruct((_N_PAR * _SUB, H), jnp.float32)),
        grid_spec=pltpu.PrefetchScalarGridSpec(
            num_scalar_prefetch=0,
            grid=(_N_PAR, tiles_per_core),
            in_specs=[
                pl.BlockSpec((tile_m, D),
                             lambda c, i: (c * tiles_per_core + i, 0)),
                pl.BlockSpec((D, H), lambda c, i: (0, 0)),      # VMEM-resident
            ],
            out_specs=(pl.BlockSpec((_SUB, H), lambda c, i: (c, 0)),
                       pl.BlockSpec((_SUB, H), lambda c, i: (c, 0))),
        ),
        compiler_params=params_a,
        cost_estimate=pl.CostEstimate(
            flops=2 * m_pad * D * H,
            transcendentals=0,
            bytes_accessed=m_pad * D * 4 + D * H * 2
                           + 2 * _N_PAR * _SUB * H * 4),
    )(x2d, w1_bf)

    # --- pass B: merge stats + BN fold + ReLU + second matmul, all fused ---
    # NOTE: if the x DMA ever shows up exposed on long grids, add
    # pipeline_mode=pl.Buffered(3) to the x BlockSpec and sweep.
    out2d = pl.pallas_call(
        functools.partial(_apply_kernel, inv_m=1.0 / M),
        out_shape=jax.ShapeDtypeStruct((m_pad, O), out_dt),
        grid_spec=pltpu.PrefetchScalarGridSpec(
            num_scalar_prefetch=0,
            grid=(n_tiles,),
            in_specs=[
                pl.BlockSpec((tile_m, D), lambda i: (i, 0)),
                pl.BlockSpec((D, H), lambda i: (0, 0)),            # VMEM-resident
                pl.BlockSpec((_N_PAR * _SUB, H), lambda i: (0, 0)),
                pl.BlockSpec((_N_PAR * _SUB, H), lambda i: (0, 0)),
                pl.BlockSpec((1, H), lambda i: (0, 0)),
                pl.BlockSpec((1, H), lambda i: (0, 0)),
                pl.BlockSpec((H, O), lambda i: (0, 0)),            # VMEM-resident
                pl.BlockSpec((1, O), lambda i: (0, 0)),
            ],
            out_specs=pl.BlockSpec((tile_m, O), lambda i: (i, 0)),
        ),
        compiler_params=params_b,
        cost_estimate=pl.CostEstimate(
            flops=2 * m_pad * (D * H + H * O),
            transcendentals=n_tiles * H,
            bytes_accessed=(m_pad * D * 4 + D * H * 2 + H * O * 2
                            + m_pad * O * out_bytes)),
    )(x2d, w1_bf, col_sum, col_sq, gamma, beta, w2_bf, b2)

    return out2d[:M].reshape(B, N, O)


def init_params(key, input_dim, hidden_size, output_dim):
    k1, k2, k3 = jax.random.split(key, 3)
    # nn.Linear default init scale ~ U(-1/sqrt(fan_in), 1/sqrt(fan_in)).
    w1 = jax.random.uniform(k1, (hidden_size, input_dim), jnp.float32,
                            -1.0 / jnp.sqrt(input_dim), 1.0 / jnp.sqrt(input_dim))
    w2 = jax.random.uniform(k2, (output_dim, hidden_size), jnp.float32,
                            -1.0 / jnp.sqrt(hidden_size), 1.0 / jnp.sqrt(hidden_size))
    b2 = jax.random.uniform(k3, (output_dim,), jnp.float32,
                            -1.0 / jnp.sqrt(hidden_size), 1.0 / jnp.sqrt(hidden_size))
    gamma = jnp.ones((hidden_size,), jnp.float32)
    beta = jnp.zeros((hidden_size,), jnp.float32)
    # Pre-transpose to (in, out) for row-major MXU matmuls in the kernel.
    return (w1.T, gamma.reshape(1, -1), beta.reshape(1, -1),
            w2.T, b2.reshape(1, -1))


if __name__ == "__main__":
    # Small but lane-dense shapes: feature dims are multiples of 128 so the
    # output store is unmasked and the MXU/vregs are not mostly idle.
    B, N = 2, 128            # batch, sequence  -> M = 256 tokens
    D, H, O = 128, 256, 128  # input_dim, hidden_size, output_dim

    key = jax.random.PRNGKey(0)
    kx, kp = jax.random.split(key)
    x = jax.random.normal(kx, (B, N, D), jnp.float32)
    w1_t, gamma, beta, w2_t, b2 = init_params(kp, D, H, O)

    # tile_m=64 exercises multi-tile accumulation and the 2-way parallel
    # split at demo shapes; leave tile_m=None in production (VMEM-derived).
    out = mlp_forward(x, w1_t, gamma, beta, w2_t, b2, tile_m=64)
    out = jax.block_until_ready(out)

    # Pure-JAX reference using the same bf16-at-MXU / f32-elementwise recipe.
    x2d = x.reshape(B * N, D)
    h = jnp.dot(x2d.astype(jnp.bfloat16), w1_t.astype(jnp.bfloat16),
                preferred_element_type=jnp.float32)
    mu = h.mean(0, keepdims=True)
    va = ((h - mu) ** 2).mean(0, keepdims=True)          # biased variance
    hn = (h - mu) * jax.lax.rsqrt(va + _EPS) * gamma + beta
    hr = jnp.maximum(hn, 0.0)
    y_ref = (jnp.dot(hr.astype(jnp.bfloat16), w2_t.astype(jnp.bfloat16),
                     preferred_element_type=jnp.float32) + b2).reshape(B, N, O)

    err = float(jnp.max(jnp.abs(out - y_ref)))
    assert jnp.allclose(out, y_ref, atol=2e-3, rtol=2e-3), f"max abs err {err}"

    print("KERNEL_OK")
</pallas_src>

<mosaic_0001>
module attributes {stable_mosaic.version = 11 : i64} {
  func.func @_apply_kernel(%arg0: i32, %arg1: memref<64x128xf32, #tpu.memory_space<vmem>>, %arg2: memref<128x256xbf16, #tpu.memory_space<vmem>>, %arg3: memref<16x256xf32, #tpu.memory_space<vmem>>, %arg4: memref<16x256xf32, #tpu.memory_space<vmem>>, %arg5: memref<1x256xf32, #tpu.memory_space<vmem>>, %arg6: memref<1x256xf32, #tpu.memory_space<vmem>>, %arg7: memref<256x128xbf16, #tpu.memory_space<vmem>>, %arg8: memref<1x128xf32, #tpu.memory_space<vmem>>, %arg9: memref<64x128xf32, #tpu.memory_space<vmem>>) attributes {dimension_semantics = [#tpu.dimension_semantics<parallel>], iteration_bounds = array<i64: 4>, scalar_prefetch = 0 : i64, scratch_operands = 0 : i64, tpu.core_type = #tpu.core_type<tc>, window_params = [{transform_indices = @transform_0, window_bounds = array<i64: 64, 128>}, {pipeline_mode = #tpu.pipeline_mode<synchronous>, transform_indices = @transform_1, window_bounds = array<i64: 128, 256>}, {pipeline_mode = #tpu.pipeline_mode<synchronous>, transform_indices = @transform_2, window_bounds = array<i64: 16, 256>}, {pipeline_mode = #tpu.pipeline_mode<synchronous>, transform_indices = @transform_3, window_bounds = array<i64: 16, 256>}, {pipeline_mode = #tpu.pipeline_mode<synchronous>, transform_indices = @transform_4, window_bounds = array<i64: 1, 256>}, {pipeline_mode = #tpu.pipeline_mode<synchronous>, transform_indices = @transform_5, window_bounds = array<i64: 1, 256>}, {pipeline_mode = #tpu.pipeline_mode<synchronous>, transform_indices = @transform_6, window_bounds = array<i64: 256, 128>}, {pipeline_mode = #tpu.pipeline_mode<synchronous>, transform_indices = @transform_7, window_bounds = array<i64: 1, 128>}, {transform_indices = @transform_8, window_bounds = array<i64: 64, 128>}]} {
    %c0 = arith.constant 0 : index
    %c0_0 = arith.constant 0 : index
    %0 = vector.load %arg3[%c0, %c0_0] : memref<16x256xf32, #tpu.memory_space<vmem>>, vector<16x256xf32>
    %cst = arith.constant dense<0.000000e+00> : vector<256xf32>
    %1 = vector.multi_reduction <add>, %0, %cst [0] : vector<16x256xf32> to vector<256xf32>
    %2 = vector.shape_cast %1 : vector<256xf32> to vector<1x256xf32>
    %c0_1 = arith.constant 0 : index
    %c0_2 = arith.constant 0 : index
    %3 = vector.load %arg4[%c0_1, %c0_2] : memref<16x256xf32, #tpu.memory_space<vmem>>, vector<16x256xf32>
    %cst_3 = arith.constant dense<0.000000e+00> : vector<256xf32>
    %4 = vector.multi_reduction <add>, %3, %cst_3 [0] : vector<16x256xf32> to vector<256xf32>
    %5 = vector.shape_cast %4 : vector<256xf32> to vector<1x256xf32>
    %cst_4 = arith.constant 3.906250e-03 : f32
    %6 = vector.broadcast %cst_4 : f32 to vector<1x256xf32>
    %7 = arith.mulf %2, %6 : vector<1x256xf32>
    %cst_5 = arith.constant 3.906250e-03 : f32
    %8 = vector.broadcast %cst_5 : f32 to vector<1x256xf32>
    %9 = arith.mulf %5, %8 : vector<1x256xf32>
    %10 = arith.mulf %7, %7 : vector<1x256xf32>
    %11 = arith.subf %9, %10 : vector<1x256xf32>
    %cst_6 = arith.constant 0.000000e+00 : f32
    %12 = vector.broadcast %cst_6 : f32 to vector<1x256xf32>
    %13 = arith.maximumf %11, %12 : vector<1x256xf32>
    %c0_7 = arith.constant 0 : index
    %c0_8 = arith.constant 0 : index
    %14 = vector.load %arg5[%c0_7, %c0_8] : memref<1x256xf32, #tpu.memory_space<vmem>>, vector<1x256xf32>
    %cst_9 = arith.constant 9.99999974E-6 : f32
    %15 = vector.broadcast %cst_9 : f32 to vector<1x256xf32>
    %16 = arith.addf %13, %15 : vector<1x256xf32>
    %17 = math.rsqrt %16 : vector<1x256xf32>
    %18 = arith.mulf %14, %17 : vector<1x256xf32>
    %c0_10 = arith.constant 0 : index
    %c0_11 = arith.constant 0 : index
    %19 = vector.load %arg6[%c0_10, %c0_11] : memref<1x256xf32, #tpu.memory_space<vmem>>, vector<1x256xf32>
    %20 = arith.mulf %7, %18 : vector<1x256xf32>
    %21 = arith.subf %19, %20 : vector<1x256xf32>
    %c0_12 = arith.constant 0 : index
    %c0_13 = arith.constant 0 : index
    %22 = vector.load %arg1[%c0_12, %c0_13] : memref<64x128xf32, #tpu.memory_space<vmem>>, vector<64x128xf32>
    %23 = arith.truncf %22 : vector<64x128xf32> to vector<64x128xbf16>
    %c0_14 = arith.constant 0 : index
    %c0_15 = arith.constant 0 : index
    %24 = vector.load %arg2[%c0_14, %c0_15] : memref<128x256xbf16, #tpu.memory_space<vmem>>, vector<128x256xbf16>
    %cst_16 = arith.constant dense<0.000000e+00> : vector<64x256xf32>
    %25 = tpu.matmul %23, %24, %cst_16 {dimension_numbers = #tpu.dot_dimension_numbers<[1], [0], [0], [1], [0, 0, 1, 1], [], []>} : vector<64x128xbf16>, vector<128x256xbf16>, vector<64x256xf32> -> vector<64x256xf32>
    %26 = vector.broadcast %18 : vector<1x256xf32> to vector<64x256xf32>
    %27 = arith.mulf %25, %26 : vector<64x256xf32>
    %28 = vector.broadcast %21 : vector<1x256xf32> to vector<64x256xf32>
    %29 = arith.addf %27, %28 : vector<64x256xf32>
    %cst_17 = arith.constant 0.000000e+00 : f32
    %30 = vector.broadcast %cst_17 : f32 to vector<64x256xf32>
    %31 = arith.maximumf %29, %30 : vector<64x256xf32>
    %32 = arith.truncf %31 : vector<64x256xf32> to vector<64x256xbf16>
    %c0_18 = arith.constant 0 : index
    %c0_19 = arith.constant 0 : index
    %33 = vector.load %arg7[%c0_18, %c0_19] : memref<256x128xbf16, #tpu.memory_space<vmem>>, vector<256x128xbf16>
    %cst_20 = arith.constant dense<0.000000e+00> : vector<64x128xf32>
    %34 = tpu.matmul %32, %33, %cst_20 {dimension_numbers = #tpu.dot_dimension_numbers<[1], [0], [0], [1], [0, 0, 1, 1], [], []>} : vector<64x256xbf16>, vector<256x128xbf16>, vector<64x128xf32> -> vector<64x128xf32>
    %c0_21 = arith.constant 0 : index
    %c0_22 = arith.constant 0 : index
    %35 = vector.load %arg8[%c0_21, %c0_22] : memref<1x128xf32, #tpu.memory_space<vmem>>, vector<1x128xf32>
    %36 = vector.broadcast %35 : vector<1x128xf32> to vector<64x128xf32>
    %37 = arith.addf %34, %36 : vector<64x128xf32>
    %c0_23 = arith.constant 0 : index
    %c0_24 = arith.constant 0 : index
    %38 = vector.load %arg9[%c0_23, %c0_24] : memref<64x128xf32, #tpu.memory_space<vmem>>, vector<64x128xf32>
    tpu.vector_store %arg9[%c0_23, %c0_24], %37 {strides = array<i32>} : memref<64x128xf32, #tpu.memory_space<vmem>>, vector<64x128xf32>,
    return
  }
  func.func @transform_0(%arg0: i32) -> (i32, i32) {
    %c0_i32 = arith.constant 0 : i32
    %c0_i32_0 = arith.constant 0 : i32
    return %arg0, %c0_i32 : i32, i32
  }
  func.func @transform_1(%arg0: i32) -> (i32, i32) {
    %c0_i32 = arith.constant 0 : i32
    %c0_i32_0 = arith.constant 0 : i32
    %c0_i32_1 = arith.constant 0 : i32
    return %c0_i32, %c0_i32_0 : i32, i32
  }
  func.func @transform_2(%arg0: i32) -> (i32, i32) {
    %c0_i32 = arith.constant 0 : i32
    %c0_i32_0 = arith.constant 0 : i32
    %c0_i32_1 = arith.constant 0 : i32
    return %c0_i32, %c0_i32_0 : i32, i32
  }
  func.func @transform_3(%arg0: i32) -> (i32, i32) {
    %c0_i32 = arith.constant 0 : i32
    %c0_i32_0 = arith.constant 0 : i32
    %c0_i32_1 = arith.constant 0 : i32
    return %c0_i32, %c0_i32_0 : i32, i32
  }
  func.func @transform_4(%arg0: i32) -> (i32, i32) {
    %c0_i32 = arith.constant 0 : i32
    %c0_i32_0 = arith.constant 0 : i32
    %c0_i32_1 = arith.constant 0 : i32
    return %c0_i32, %c0_i32_0 : i32, i32
  }
  func.func @transform_5(%arg0: i32) -> (i32, i32) {
    %c0_i32 = arith.constant 0 : i32
    %c0_i32_0 = arith.constant 0 : i32
    %c0_i32_1 = arith.constant 0 : i32
    return %c0_i32, %c0_i32_0 : i32, i32
  }
  func.func @transform_6(%arg0: i32) -> (i32, i32) {
    %c0_i32 = arith.constant 0 : i32
    %c0_i32_0 = arith.constant 0 : i32
    %c0_i32_1 = arith.constant 0 : i32
    return %c0_i32, %c0_i32_0 : i32, i32
  }
  func.func @transform_7(%arg0: i32) -> (i32, i32) {
    %c0_i32 = arith.constant 0 : i32
    %c0_i32_0 = arith.constant 0 : i32
    %c0_i32_1 = arith.constant 0 : i32
    return %c0_i32, %c0_i32_0 : i32, i32
  }
  func.func @transform_8(%arg0: i32) -> (i32, i32) {
    %c0_i32 = arith.constant 0 : i32
    %c0_i32_0 = arith.constant 0 : i32
    return %arg0, %c0_i32 : i32, i32
  }
}

module attributes {stable_mosaic.version = 11 : i64} {
  func.func @_stats_kernel(%arg0: i32, %arg1: i32, %arg2: memref<64x128xf32, #tpu.memory_space<vmem>>, %arg3: memref<128x256xbf16, #tpu.memory_space<vmem>>, %arg4: memref<8x256xf32, #tpu.memory_space<vmem>>, %arg5: memref<8x256xf32, #tpu.memory_space<vmem>>) attributes {dimension_semantics = [#tpu.dimension_semantics<parallel>, #tpu.dimension_semantics<arbitrary>], iteration_bounds = array<i64: 2, 2>, scalar_prefetch = 0 : i64, scratch_operands = 0 : i64, tpu.core_type = #tpu.core_type<tc>, window_params = [{transform_indices = @transform_0, window_bounds = array<i64: 64, 128>}, {pipeline_mode = #tpu.pipeline_mode<synchronous>, transform_indices = @transform_1, window_bounds = array<i64: 128, 256>}, {transform_indices = @transform_2, window_bounds = array<i64: 8, 256>}, {transform_indices = @transform_3, window_bounds = array<i64: 8, 256>}]} {
    %c0_i32 = arith.constant 0 : i32
    %0 = arith.cmpi eq, %arg1, %c0_i32 : i32
    %1 = arith.extui %0 : i1 to i32
    %c0_i32_0 = arith.constant 0 : i32
    %2 = arith.cmpi ne, %1, %c0_i32_0 : i32
    scf.if %2 {
      %cst_14 = arith.constant 0.000000e+00 : f32
      %18 = vector.broadcast %cst_14 : f32 to vector<8x256xf32>
      %c0_15 = arith.constant 0 : index
      %c0_16 = arith.constant 0 : index
      %19 = vector.load %arg4[%c0_15, %c0_16] : memref<8x256xf32, #tpu.memory_space<vmem>>, vector<8x256xf32>
      tpu.vector_store %arg4[%c0_15, %c0_16], %18 {strides = array<i32>} : memref<8x256xf32, #tpu.memory_space<vmem>>, vector<8x256xf32>,
      %cst_17 = arith.constant 0.000000e+00 : f32
      %20 = vector.broadcast %cst_17 : f32 to vector<8x256xf32>
      %c0_18 = arith.constant 0 : index
      %c0_19 = arith.constant 0 : index
      %21 = vector.load %arg5[%c0_18, %c0_19] : memref<8x256xf32, #tpu.memory_space<vmem>>, vector<8x256xf32>
      tpu.vector_store %arg5[%c0_18, %c0_19], %20 {strides = array<i32>} : memref<8x256xf32, #tpu.memory_space<vmem>>, vector<8x256xf32>,
    } else {
    }
    %c0 = arith.constant 0 : index
    %c0_1 = arith.constant 0 : index
    %3 = vector.load %arg2[%c0, %c0_1] : memref<64x128xf32, #tpu.memory_space<vmem>>, vector<64x128xf32>
    %4 = arith.truncf %3 : vector<64x128xf32> to vector<64x128xbf16>
    %c0_2 = arith.constant 0 : index
    %c0_3 = arith.constant 0 : index
    %5 = vector.load %arg3[%c0_2, %c0_3] : memref<128x256xbf16, #tpu.memory_space<vmem>>, vector<128x256xbf16>
    %cst = arith.constant dense<0.000000e+00> : vector<64x256xf32>
    %6 = tpu.matmul %4, %5, %cst {dimension_numbers = #tpu.dot_dimension_numbers<[1], [0], [0], [1], [0, 0, 1, 1], [], []>} : vector<64x128xbf16>, vector<128x256xbf16>, vector<64x256xf32> -> vector<64x256xf32>
    %c0_4 = arith.constant 0 : index
    %c0_5 = arith.constant 0 : index
    %7 = vector.load %arg4[%c0_4, %c0_5] : memref<8x256xf32, #tpu.memory_space<vmem>>, vector<1x256xf32>
    %cst_6 = arith.constant dense<0.000000e+00> : vector<256xf32>
    %8 = vector.multi_reduction <add>, %6, %cst_6 [0] : vector<64x256xf32> to vector<256xf32>
    %9 = vector.shape_cast %8 : vector<256xf32> to vector<1x256xf32>
    %10 = arith.addf %7, %9 : vector<1x256xf32>
    %c0_7 = arith.constant 0 : index
    %c0_8 = arith.constant 0 : index
    %11 = vector.load %arg4[%c0_7, %c0_8] : memref<8x256xf32, #tpu.memory_space<vmem>>, vector<1x256xf32>
    tpu.vector_store %arg4[%c0_7, %c0_8], %10 {strides = array<i32>} : memref<8x256xf32, #tpu.memory_space<vmem>>, vector<1x256xf32>,
    %c0_9 = arith.constant 0 : index
    %c0_10 = arith.constant 0 : index
    %12 = vector.load %arg5[%c0_9, %c0_10] : memref<8x256xf32, #tpu.memory_space<vmem>>, vector<1x256xf32>
    %13 = arith.mulf %6, %6 : vector<64x256xf32>
    %cst_11 = arith.constant dense<0.000000e+00> : vector<256xf32>
    %14 = vector.multi_reduction <add>, %13, %cst_11 [0] : vector<64x256xf32> to vector<256xf32>
    %15 = vector.shape_cast %14 : vector<256xf32> to vector<1x256xf32>
    %16 = arith.addf %12, %15 : vector<1x256xf32>
    %c0_12 = arith.constant 0 : index
    %c0_13 = arith.constant 0 : index
    %17 = vector.load %arg5[%c0_12, %c0_13] : memref<8x256xf32, #tpu.memory_space<vmem>>, vector<1x256xf32>
    tpu.vector_store %arg5[%c0_12, %c0_13], %16 {strides = array<i32>} : memref<8x256xf32, #tpu.memory_space<vmem>>, vector<1x256xf32>,
    return
  }
  func.func @transform_0(%arg0: i32, %arg1: i32) -> (i32, i32) {
    %c2_i32 = arith.constant 2 : i32
    %0 = arith.muli %arg0, %c2_i32 : i32
    %1 = arith.addi %0, %arg1 : i32
    %c0_i32 = arith.constant 0 : i32
    %c0_i32_0 = arith.constant 0 : i32
    return %1, %c0_i32 : i32, i32
  }
  func.func @transform_1(%arg0: i32, %arg1: i32) -> (i32, i32) {
    %c0_i32 = arith.constant 0 : i32
    %c0_i32_0 = arith.constant 0 : i32
    %c0_i32_1 = arith.constant 0 : i32
    return %c0_i32, %c0_i32_0 : i32, i32
  }
  func.func @transform_2(%arg0: i32, %arg1: i32) -> (i32, i32) {
    %c0_i32 = arith.constant 0 : i32
    %c0_i32_0 = arith.constant 0 : i32
    return %arg0, %c0_i32 : i32, i32
  }
  func.func @transform_3(%arg0: i32, %arg1: i32) -> (i32, i32) {
    %c0_i32 = arith.constant 0 : i32
    %c0_i32_0 = arith.constant 0 : i32
    return %arg0, %c0_i32 : i32, i32
  }
}

</mosaic_0001>

<bundles_post_ra>
// kernel: mlp_forward.2
= control target key start
LH: loop header
LB: loop body
LE: loop exit
PB: predicated region body
PF: predicated region fallthrough
CT: control target
= control target key end

     0   :  { %s798_s12 = smov 0   ;;  %s800_s13 = smov 0   ;;  %s922_s0 = inlined_call_operand.vmem [shape: f32[256,128], index: 0, kind: input, shape index: {}]   ;;  %s923_s1 = inlined_call_operand.vmem [shape: bf16[128,256], index: 1, kind: input, shape index: {}]   ;;  %s924_s2 = inlined_call_operand.vmem [shape: f32[16,256], index: 2, kind: output, shape index: {0}]   ;;  %s925_s3 = inlined_call_operand.vmem [shape: f32[16,256], index: 3, kind: output, shape index: {1}]  }
   0x1   :  { %s802_s14 = smov 0   ;;  %s804_s15 = smov 0  }
   0x2   :  { %s806_s16 = smov 0  }
   0x3 LB: > { %s23_s17 = sadd.s32 1, %s765_s14  ;;  %s26_s18 = sadd.s32 1, %s769_s15  ;;  %s773_s16 = sphi %s806_s16, %s14_s16   ;;  %s769_s15 = sphi %s804_s15, %s929_s15   ;;  %s765_s14 = sphi %s802_s14, %s928_s14   ;;  %s761_s13 = sphi %s800_s13, %s927_s13   ;;  %s757_s12 = sphi %s798_s12, %s926_s12  }
   0x4   : > { %p24_p0 = scmp.ge.s32.totalorder %s23_s17, 2  ;;  %p623_p1 = scmp.ge.s32.totalorder %s773_s16, 1 }
   0x5   : > { %p161_p2 = scmp.lt.s32.totalorder %s773_s16, 5 }
   0x6   : > { %s931_s17 = smov (%p24_p0, %s23_s17), 0  ;;  %s933_s18 = smov (!%p24_p0, %s26_s18), %s769_s15 }
   0x7   : > { %p162_p3 = pnand %p623_p1, %p161_p2  ;;  %p28_p4 = scmp.ge.s32.totalorder %s933_s18, 2 }
   0x8   : > { %s624_s19 = sshll.u32 (!%p162_p3), %s761_s13, 1  ;;  %p202_p5 = scmp.lt.s32.totalorder (!%p162_p3), %s761_s13, 1 }
   0x9   : > { %s935_s18 = smov (%p28_p4, %s933_s18), 0  ;;  %165 = sbr.rel (%p162_p3) target bundleno = 299 (0x12b), region = 28 }
   0xa   : > { %s193_s20 = sadd.s32 (!%p162_p3), %s757_s12, %s624_s19  ;;  %p631_p7 = scmp.ne.s32.totalorder (!%p162_p3), %s757_s12, 0 }
   0xb   : > { %s625_s21 = sshll.u32 (!%p162_p3), %s193_s20, 3 }
   0xc   : > { %p195_p6 = scmp.lt.s32.totalorder (!%p162_p3), %s625_s21, 31 }
   0xe   : > { %s937_s13 = smov (!%p202_p5, %s761_s13), 1  ;;  %s939_s21 = smov (!%p195_p6, %s625_s21), 31 }
   0xf   : > { %s650_s22 = sshll.u32 %s937_s13, 4  ;;  %s626_s23 = sshll.u32 %s939_s21, 3 }
  0x10   : > { %s831_s26 = scalar_lea.vmem %s924_s2, %s650_s22  ;;  %s836_s29 = scalar_lea.vmem %s922_s0, %s626_s23 }
  0x11   : > { %s841_s5 = scalar_lea.vmem %s925_s3, %s650_s22  ;;  %216 = sbr.rel (%p631_p7) target bundleno = 25 (0x19), region = 32 }
  0x16   : > { %v775_v0 = vmov 0.0  }
  0x17   : > { %217 = vst [vmem:[%s831_s26] sm:$0xff] %v775_v0  ;;  %218 = vst [vmem:[%s831_s26 + $0x8] sm:$0xff] %v775_v0 }
  0x18   : > { %219 = vst [vmem:[%s841_s5] sm:$0xff] %v775_v0  ;;  %220 = vst [vmem:[%s841_s5 + $0x8] sm:$0xff] %v775_v0 }
  0x19 PF: > { %v711_v1 = vld [vmem:[%s923_s1 + $0x74] ss:$8 sps:$4 sm:$0xff]   ;;  %v713_v2 = vld [vmem:[%s923_s1 + $0x70] ss:$8 sps:$4 sm:$0xff]   ;;  %v776_v3 = vmov 0   ;;  %v221_v18 = vld [vmem:[%s836_s29] sm:$0xff] }
  0x1a   : > { %361 = vmatprep.mubr.bf16.mxu0 %v776_v3  ;;  %381 = vmatprep.mubr.bf16.mxu1 %v776_v3  ;;  %v714_v4 = vld [vmem:[%s923_s1 + $0x64] ss:$8 sps:$4 sm:$0xff]   ;;  %v716_v5 = vld [vmem:[%s923_s1 + $0x60] ss:$8 sps:$4 sm:$0xff]   ;;  %v717_v6 = vld [vmem:[%s923_s1 + $0x54] ss:$8 sps:$4 sm:$0xff]  }
  0x1b   : > { %329 = vmatprep.subr.bf16.mxu0 %v711_v1  ;;  %652 = vmatprep.subr.bf16.mxu1 %v711_v1  ;;  %v719_v7 = vld [vmem:[%s923_s1 + $0x50] ss:$8 sps:$4 sm:$0xff]   ;;  %v720_v8 = vld [vmem:[%s923_s1 + $0x44] ss:$8 sps:$4 sm:$0xff]   ;;  %v722_v9 = vld [vmem:[%s923_s1 + $0x40] ss:$8 sps:$4 sm:$0xff]  }
  0x1c   : > { %330 = vmatpush1.bf16.msra.mxu0 %v713_v2  ;;  %660 = vmatpush1.bf16.msra.mxu1 %v713_v2  ;;  %v723_v10 = vld [vmem:[%s923_s1 + $0x34] ss:$8 sps:$4 sm:$0xff]   ;;  %v725_v11 = vld [vmem:[%s923_s1 + $0x30] ss:$8 sps:$4 sm:$0xff]   ;;  %v726_v12 = vld [vmem:[%s923_s1 + $0x24] ss:$8 sps:$4 sm:$0xff]  }
  0x1d   : > { %331 = vmatprep.subr.bf16.mxu0 %v714_v4  ;;  %653 = vmatprep.subr.bf16.mxu1 %v714_v4  ;;  %v728_v13 = vld [vmem:[%s923_s1 + $0x20] ss:$8 sps:$4 sm:$0xff]   ;;  %v729_v14 = vld [vmem:[%s923_s1 + $0x14] ss:$8 sps:$4 sm:$0xff]   ;;  %v731_v15 = vld [vmem:[%s923_s1 + $0x10] ss:$8 sps:$4 sm:$0xff]  }
  0x1e   : > { %v732_v16 = vld [vmem:[%s923_s1 + $0x4] ss:$8 sps:$4 sm:$0xff]   ;;  %v734_v17 = vld [vmem:[%s923_s1] ss:$8 sps:$4 sm:$0xff]   ;;  %v223_v24 = vld [vmem:[%s836_s29 + $0x10] sm:$0xff] }
  0x1f   : > { %v222_v19 = vld [vmem:[%s836_s29 + $0x8] sm:$0xff]  ;;  %v225_v20 = vld [vmem:[%s836_s29 + $0x20] sm:$0xff]  ;;  %v224_v25 = vld [vmem:[%s836_s29 + $0x18] sm:$0xff] }
  0x20   : > { %332 = vmatpush1.bf16.msra.mxu0 %v716_v5  ;;  %661 = vmatpush1.bf16.msra.mxu1 %v716_v5  ;;  %v226_v21 = vld [vmem:[%s836_s29 + $0x28] sm:$0xff]  ;;  %v229_v22 = vpack.c.bf16 %v222_v19, %v221_v18  ;;  %v227_v26 = vld [vmem:[%s836_s29 + $0x30] sm:$0xff]  ;;  %v228_v27 = vld [vmem:[%s836_s29 + $0x38] sm:$0xff]  ;;  %v230_v28 = vpack.c.bf16 %v224_v25, %v223_v24 }
  0x21   : > { %333 = vmatprep.subr.bf16.mxu0 %v717_v6  ;;  %654 = vmatprep.subr.bf16.mxu1 %v717_v6  ;;  %v231_v23 = vpack.c.bf16 %v226_v21, %v225_v20  ;;  %v232_v29 = vpack.c.bf16 %v228_v27, %v227_v26 }
  0x24   : > { %334 = vmatpush1.bf16.msra.mxu0 %v719_v7  ;;  %662 = vmatpush1.bf16.msra.mxu1 %v719_v7 }
  0x25   : > { %335 = vmatprep.subr.bf16.mxu0 %v720_v8  ;;  %655 = vmatprep.subr.bf16.mxu1 %v720_v8 }
  0x28   : > { %336 = vmatpush1.bf16.msra.mxu0 %v722_v9  ;;  %663 = vmatpush1.bf16.msra.mxu1 %v722_v9 }
  0x29   : > { %337 = vmatprep.subr.bf16.mxu0 %v723_v10  ;;  %656 = vmatprep.subr.bf16.mxu1 %v723_v10 }
  0x2c   : > { %338 = vmatpush1.bf16.msra.mxu0 %v725_v11  ;;  %664 = vmatpush1.bf16.msra.mxu1 %v725_v11 }
  0x2d   : > { %339 = vmatprep.subr.bf16.mxu0 %v726_v12  ;;  %657 = vmatprep.subr.bf16.mxu1 %v726_v12 }
  0x30   : > { %340 = vmatpush1.bf16.msra.mxu0 %v728_v13  ;;  %665 = vmatpush1.bf16.msra.mxu1 %v728_v13 }
  0x31   : > { %341 = vmatprep.subr.bf16.mxu0 %v729_v14  ;;  %658 = vmatprep.subr.bf16.mxu1 %v729_v14 }
  0x34   : > { %342 = vmatpush1.bf16.msra.mxu0 %v731_v15  ;;  %666 = vmatpush1.bf16.msra.mxu1 %v731_v15 }
  0x35   : > { %343 = vmatprep.subr.bf16.mxu0 %v732_v16  ;;  %659 = vmatprep.subr.bf16.mxu1 %v732_v16 }
  0x38   : > { %344 = vmatpush1.bf16.msra.mxu0 %v734_v17  ;;  %667 = vmatpush1.bf16.msra.mxu1 %v734_v17 }
  0x3b   : > { %362 = vmatmul.mubr.bf16.vlgmr.msra.gmra.mxu0 %v229_v22  ;;  %382 = vmatmul.mubr.bf16.vlgmr.msra.gmra.mxu1 %v231_v23 }
  0x3c   : > { %371 = vmatprep.mubr.bf16.mxu0 %v776_v3  ;;  %391 = vmatprep.mubr.bf16.mxu1 %v776_v3 }
  0x43   : > { %372 = vmatmul.mubr.bf16.gmra.mxu0 %v230_v28  ;;  %392 = vmatmul.mubr.bf16.gmra.mxu1 %v232_v29 }
  0xfb   : > { %v363_v30 = vpop.f32.mrf.mxu0  ;;  %v383_v31 = vpop.f32.mrf.mxu1 }
  0xfc   : > { %v455_v42 = vmul.f32 %v363_v30, %v363_v30  ;;  %v463_v58 = vmul.f32 %v383_v31, %v383_v31 }
  0xfd   : > { %v365_v32 = vpop.f32.mrf.mxu0  ;;  %v385_v33 = vpop.f32.mrf.mxu1 }
  0xfe   : > { %v456_v45 = vmul.f32 %v365_v32, %v365_v32  ;;  %v464_v2 = vmul.f32 %v385_v33, %v385_v33 }
  0xff   : > { %v367_v34 = vpop.f32.mrf.mxu0  ;;  %v387_v35 = vpop.f32.mrf.mxu1 }
 0x100   : > { %v457_v38 = vmul.f32 %v367_v34, %v367_v34  ;;  %v403_v43 = vadd.f32 %v367_v34, %v363_v30  ;;  %v465_v3 = vmul.f32 %v387_v35, %v387_v35  ;;  %v777_v30 = vmov 1966171168  }
 0x101   : > { %v369_v36 = vpop.f32.mrf.mxu0  ;;  %v389_v37 = vpop.f32.mrf.mxu1 }
 0x102   : > { %v458_v39 = vmul.f32 %v369_v36, %v369_v36  ;;  %v471_v47 = vadd.f32 %v457_v38, %v455_v42  ;;  %v416_v48 = vadd.f32 %v369_v36, %v365_v32  ;;  %v466_v8 = vmul.f32 %v389_v37, %v389_v37 }
 0x103   : > { %v373_v40 = vpop.f32.mrf.mxu0  ;;  %v393_v41 = vpop.f32.mrf.mxu1  ;;  %v435_v32 = vlaneseq }
 0x104   : > { %v459_v44 = vmul.f32 %v373_v40, %v373_v40  ;;  %v404_v49 = vadd.f32 %v403_v43, %v373_v40  ;;  %v484_v52 = vadd.f32 %v458_v39, %v456_v45  ;;  %v467_v9 = vmul.f32 %v393_v41, %v393_v41 }
 0x105   : > { %v375_v46 = vpop.f32.mrf.mxu0  ;;  %v395_v51 = vpop.f32.mrf.mxu1  ;;  %v436_v42 = vshrl.u32 %v435_v32, 7  ;;  %vm450_vm0 = vcmp.lt.s32.totalorder %v435_v32, 256 }
 0x106   : > { %v460_v50 = vmul.f32 %v375_v46, %v375_v46  ;;  %v472_v54 = vadd.f32 %v471_v47, %v459_v44  ;;  %v417_v55 = vadd.f32 %v416_v48, %v375_v46  ;;  %v468_v15 = vmul.f32 %v395_v51, %v395_v51 }
 0x107   : > { %v377_v53 = vpop.f32.mrf.mxu0  ;;  %v397_v1 = vpop.f32.mrf.mxu1 }
 0x108   : > { %v405_v56 = vadd.f32 %v404_v49, %v377_v53  ;;  %v461_v57 = vmul.f32 %v377_v53, %v377_v53  ;;  %v485_v59 = vadd.f32 %v484_v52, %v460_v50  ;;  %v469_v16 = vmul.f32 %v397_v1, %v397_v1 }
 0x109   : > { %v379_v60 = vpop.f32.mrf.mxu0  ;;  %v399_v13 = vpop.f32.mrf.mxu1 }
 0x10a   : > { %v406_v61 = vadd.f32 %v405_v56, %v383_v31  ;;  %v473_v62 = vadd.f32 %v472_v54, %v461_v57  ;;  %v418_v63 = vadd.f32 %v417_v55, %v379_v60  ;;  %v462_v0 = vmul.f32 %v379_v60, %v379_v60 }
 0x10b   : > { %v470_v21 = vmul.f32 %v399_v13, %v399_v13  ;;  %v433_v31 = vunpack.c.l.s4 %v777_v30 }
 0x10c   : > { %v474_v4 = vadd.f32 %v473_v62, %v463_v58  ;;  %v419_v5 = vadd.f32 %v418_v63, %v385_v33  ;;  %v486_v6 = vadd.f32 %v485_v59, %v462_v0  ;;  %v407_v7 = vadd.f32 %v406_v61, %v387_v35  ;;  %v402_v59 = vld [vmem:[%s831_s26] ss:$8 sm:$0x3] }
 0x10d   : > { %v454_v62 = vld [vmem:[%s841_s5] ss:$8 sm:$0x3] }
 0x10e   : > { %v487_v10 = vadd.f32 %v486_v6, %v464_v2  ;;  %v408_v11 = vadd.f32 %v407_v7, %v393_v41  ;;  %v475_v12 = vadd.f32 %v474_v4, %v465_v3  ;;  %v420_v14 = vadd.f32 %v419_v5, %v389_v37 }
 0x10f   : > { %v434_v41 = vunpack.c.0.s8 %v433_v31 }
 0x110   : > { %v409_v17 = vadd.f32 %v408_v11, %v397_v1  ;;  %v476_v18 = vadd.f32 %v475_v12, %v467_v9  ;;  %v421_v19 = vadd.f32 %v420_v14, %v395_v51  ;;  %v488_v20 = vadd.f32 %v487_v10, %v466_v8 }
 0x111   : > { %v437_v52 = vsub.s32 %v434_v41, %v436_v42 }
 0x112   : > { %v410_v22 = vrot.slane %v409_v17, 4  ;;  %v477_v23 = vadd.f32 %v476_v18, %v469_v16  ;;  %v422_v24 = vadd.f32 %v421_v19, %v399_v13  ;;  %v489_v25 = vadd.f32 %v488_v20, %v468_v15 }
 0x114   : > { %v411_v26 = vadd.f32 %v410_v22, %v409_v17  ;;  %v478_v27 = vrot.slane %v477_v23, 4  ;;  %v423_v28 = vrot.slane %v422_v24, 4  ;;  %v490_v29 = vadd.f32 %v489_v25, %v470_v21 }
 0x116   : > { %v412_v33 = vrot.slane %v411_v26, 2  ;;  %v479_v34 = vadd.f32 %v478_v27, %v477_v23  ;;  %v424_v35 = vadd.f32 %v423_v28, %v422_v24  ;;  %v491_v36 = vrot.slane %v490_v29, 4 }
 0x118   : > { %v413_v37 = vadd.f32 %v412_v33, %v411_v26  ;;  %v480_v38 = vrot.slane %v479_v34, 2  ;;  %v425_v39 = vrot.slane %v424_v35, 2  ;;  %v492_v40 = vadd.f32 %v491_v36, %v490_v29 }
 0x11a   : > { %v414_v43 = vrot.slane %v413_v37, 1  ;;  %v481_v44 = vadd.f32 %v480_v38, %v479_v34  ;;  %v426_v45 = vadd.f32 %v425_v39, %v424_v35  ;;  %v493_v46 = vrot.slane %v492_v40, 2 }
 0x11c   : > { %v482_v47 = vrot.slane %v481_v44, 1  ;;  %v427_v48 = vrot.slane %v426_v45, 1  ;;  %v494_v49 = vadd.f32 %v493_v46, %v492_v40  ;;  %v415_v50 = vadd.f32 %v414_v43, %v413_v37 }
 0x11e   : > { %v428_v51 = vadd.f32 %v427_v48, %v426_v45  ;;  %v495_v53 = vrot.slane %v494_v49, 1  ;;  %v483_v54 = vadd.f32 %v482_v47, %v481_v44 }
 0x120   : > { %v431_v55 = vcombine.low %v415_v50, %v428_v51  ;;  %v496_v56 = vadd.f32 %v495_v53, %v494_v49 }
 0x122   : > { %v438_v57 = vrot.slane %v431_v55, %v437_v52  ;;  %v499_v58 = vcombine.low %v483_v54, %v496_v56 }
 0x124   : > { %v445_v60 = vrot.slane %v438_v57, %v437_v52  ;;  %v506_v61 = vrot.slane %v499_v58, %v437_v52 }
 0x126   : > { %v447_v63 = vadd.f32 %v445_v60, %v402_v59  ;;  %v513_v0 = vrot.slane %v506_v61, %v437_v52 }
 0x128   : > { %452 = vst.msk [vmem:[%s831_s26] ss:$8 sm:$0x3] %vm450_vm0, %v447_v63  ;;  %v515_v1 = vadd.f32 %v513_v0, %v454_v62 }
 0x12a   : > { %516 = vst.msk [vmem:[%s841_s5] ss:$8 sm:$0x3] %vm450_vm0, %v515_v1 }
 0x12b PF: > { %s14_s16 = sadd.s32 1, %s773_s16   ;;  %s926_s12 = smov %s765_s14 }
 0x12c   : > { %p11_p8 = scmp.ge.s32.totalorder %s14_s16, 6   ;;  %s927_s13 = smov %s769_s15 }
 0x12d   : > { %s928_s14 = smov %s931_s17  ;;  %s929_s15 = smov %s935_s18 }
 0x12e   :  { %13 = sbr.rel (!%p11_p8) target bundleno = 3 (0x3), region = 74 }

// kernel: mlp_forward.3
= control target key start
LH: loop header
LB: loop body
LE: loop exit
PB: predicated region body
PF: predicated region fallthrough
CT: control target
= control target key end

     0   :  { %13 = vsyncpa [#allocation3], 0  ;;  %s1529_s0 = inlined_call_operand.vmem [shape: f32[256,128], index: 0, kind: input, shape index: {}]   ;;  %s1530_s1 = inlined_call_operand.vmem [shape: bf16[128,256], index: 1, kind: input, shape index: {}]   ;;  %s1531_s2 = inlined_call_operand.vmem [shape: f32[16,256], index: 2, kind: input, shape index: {}]   ;;  %s1532_s3 = inlined_call_operand.vmem [shape: f32[16,256], index: 3, kind: input, shape index: {}]   ;;  %s1533_s4 = inlined_call_operand.vmem [shape: f32[1,256], index: 4, kind: input, shape index: {}]   ;;  %s1534_s5 = inlined_call_operand.vmem [shape: f32[1,256], index: 5, kind: input, shape index: {}]   ;;  %s1535_s6 = inlined_call_operand.vmem [shape: bf16[256,128], index: 6, kind: input, shape index: {}]   ;;  %s1536_s7 = inlined_call_operand.vmem [shape: f32[1,128], index: 7, kind: input, shape index: {}]   ;;  %s1537_s8 = inlined_call_operand.hbm [shape: f32[256,128], index: 8, kind: output, shape index: {}]  }
   0x1   :  { %15 = vsyncpa [#allocation3 + $0x1], 0  ;;  %s1228_s27 = smov 0   ;;  %s1230_s28 = smov 0  }
   0x2   :  { %s1232_s29 = smov 0   ;;  %s1234_s30 = smov 0  }
   0x3 LB: > { %s1249_s9 = sadd.s32 4294967295, %s1176_s30   ;;  %s943_s10 = sadd.s32 4294967294, %s1176_s30   ;;  %s1176_s30 = sphi %s1234_s30, %s1543_s30   ;;  %s1172_s29 = sphi %s1232_s29, %s1542_s29   ;;  %s1168_s28 = sphi %s1230_s28, %s1541_s28   ;;  %s1164_s27 = sphi %s1228_s27, %s1540_s27  }
   0x4   : > { %s1253_s11 = sadd.s32 1, %s1176_s30   ;;  %s201_s12 = sadd.s32 1, %s1172_s29 }
   0x5   : > { %s198_s13 = ssub.s32 %s1176_s30, %s1253_s11  ;;  %p211_p0 = scmp.ne.s32.totalorder %s1172_s29, %s1168_s28 }
   0x6   : > { %p199_p1 = scmp.eq.s32.totalorder %s198_s13, 0  ;;  %p212_p2 = scmp.eq.s32.totalorder %s1249_s9, 3 }
   0x7   : > { %p217_p3 = scmp.ne.s32.totalorder %s1168_s28, %s1164_s27  ;;  %p218_p4 = scmp.eq.s32.totalorder %s943_s10, 3 }
   0x8   : > { %s1264_s14 = scalar_select %p199_p1, %s1172_s29, %s201_s12  }
   0x9   : > { %p1266_p5 = por %p212_p2, %p211_p0  ;;  %p1270_p6 = por %p218_p4, %p217_p3 }
   0xa   : > { %p946_p7 = scmp.ge.s32.totalorder %s1176_s30, 1  ;;  %p266_p8 = scmp.lt.s32.totalorder %s1176_s30, 5 }
   0xc   : > { %p267_p9 = pnand %p946_p7, %p266_p8 }
   0xd   : > { %s948_s13 = sshll.u32 (!%p267_p9), %s1249_s9, 3  ;;  %s297_s17 = sand.u32 (!%p267_p9), 1, %s1168_s28  }
   0xe   : > { %270 = sbr.rel (%p267_p9) target bundleno = 501 (0x1f5), region = 52  ;;  %p301_p10 = scmp.lt.s32.totalorder (!%p267_p9), %s948_s13, 31 }
   0xf   : > { %s947_s18 = sshll.u32 (!%p267_p9), %s297_s17, 6  ;;  %s988_s22 = sshll.u32 (!%p267_p9), %s1249_s9, 10 }
  0x10   : > { %s1468_s20 = scalar_lea.vmem (!%p267_p9), [#allocation2], %s947_s18  ;;  %s1482_s10 = scalar_lea.hbm (!%p267_p9), %s1537_s8, %s988_s22 }
  0x11   : > { %s881_s24 = sshll.u32 (!%p267_p9), %s1468_s20, 4  ;;  %s1489_s12 = scalar_lea.sflag (!%p267_p9), [#allocation3], %s297_s17  ;;  %s1484_s24 = int_to_ptr.vmem [resolvable:$true] %s881_s24 }
  0x12   : > { %s1116_s9 = scalar_lea.vmem (!%p267_p9), %s1484_s24, 1024 }
  0x13   : > { %v1072_v0 = vld [vmem:[%s1530_s1 + $0x74] ss:$8 sps:$4 sm:$0xff]   ;;  %v1074_v1 = vld [vmem:[%s1530_s1 + $0x70] ss:$8 sps:$4 sm:$0xff]   ;;  %v1178_v2 = vmov 0   ;;  %s1545_s13 = smov (!%p301_p10, %s948_s13), 31  ;;  %p1117_p11 = scmp.ne.s32.totalorder %s1484_s24, %s1116_s9 }
  0x14   : > { %551 = vmatprep.mubr.bf16.mxu0 %v1178_v2  ;;  %519 = vmatprep.subr.bf16.mxu0 %v1072_v0  ;;  %v1075_v3 = vld [vmem:[%s1530_s1 + $0x64] ss:$8 sps:$4 sm:$0xff]   ;;  %v1077_v4 = vld [vmem:[%s1530_s1 + $0x60] ss:$8 sps:$4 sm:$0xff]   ;;  %v1078_v5 = vld [vmem:[%s1530_s1 + $0x54] ss:$8 sps:$4 sm:$0xff]  }
  0x15   : > { %520 = vmatpush1.bf16.msra.mxu0 %v1074_v1  ;;  %v1080_v6 = vld [vmem:[%s1530_s1 + $0x50] ss:$8 sps:$4 sm:$0xff]   ;;  %v1081_v7 = vld [vmem:[%s1530_s1 + $0x44] ss:$8 sps:$4 sm:$0xff]   ;;  %v1083_v8 = vld [vmem:[%s1530_s1 + $0x40] ss:$8 sps:$4 sm:$0xff]   ;;  %p1118_p12 = pnand %p1117_p11, %p1266_p5 }
  0x16   : > { %521 = vmatprep.subr.bf16.mxu0 %v1075_v3  ;;  %v1084_v9 = vld [vmem:[%s1530_s1 + $0x34] ss:$8 sps:$4 sm:$0xff]   ;;  %v1086_v10 = vld [vmem:[%s1530_s1 + $0x30] ss:$8 sps:$4 sm:$0xff]   ;;  %v1087_v11 = vld [vmem:[%s1530_s1 + $0x24] ss:$8 sps:$4 sm:$0xff]  }
  0x17   : > { %v1096_v12 = vld [vmem:[%s1535_s6 + $0x78] sm:$0xff]   ;;  %v1098_v14 = vld [vmem:[%s1535_s6 + $0x70] sm:$0xff]   ;;  %s949_s23 = sshll.u32 %s1545_s13, 3  ;;  %v1100_v16 = vld [vmem:[%s1535_s6 + $0x68] sm:$0xff]   ;;  %p1119_p13 = pneg %p1118_p12 }
  0x18   : > { %v1097_v13 = vld [vmem:[%s1535_s6 + $0x38] sm:$0xff]   ;;  %989 = vmatprep.subr.bf16.mxu1 %v1096_v12  ;;  %v1099_v15 = vld [vmem:[%s1535_s6 + $0x30] sm:$0xff]   ;;  %v1089_v17 = vld [vmem:[%s1530_s1 + $0x20] ss:$8 sps:$4 sm:$0xff]   ;;  %s1338_s21 = scalar_lea.vmem %s1529_s0, %s949_s23 }
  0x19   : > { %522 = vmatpush1.bf16.msra.mxu0 %v1077_v4  ;;  %990 = vmatpush3.bf16.msra.mxu1 %v1097_v13  ;;  %v1090_v18 = vld [vmem:[%s1530_s1 + $0x14] ss:$8 sps:$4 sm:$0xff]   ;;  %v1101_v19 = vld [vmem:[%s1535_s6 + $0x28] sm:$0xff]   ;;  %v1102_v20 = vld [vmem:[%s1535_s6 + $0x60] sm:$0xff]  }
  0x1a   : > { %523 = vmatprep.subr.bf16.mxu0 %v1078_v5  ;;  %991 = vmatprep.subr.bf16.mxu1 %v1098_v14  ;;  %v1092_v21 = vld [vmem:[%s1530_s1 + $0x10] ss:$8 sps:$4 sm:$0xff]   ;;  %v1093_v22 = vld [vmem:[%s1530_s1 + $0x4] ss:$8 sps:$4 sm:$0xff]   ;;  %v1095_v23 = vld [vmem:[%s1530_s1] ss:$8 sps:$4 sm:$0xff]  }
  0x1b   : > { %v411_v24 = vld [vmem:[%s1338_s21] sm:$0xff]  ;;  %v412_v26 = vld [vmem:[%s1338_s21 + $0x8] sm:$0xff]  ;;  %v413_v28 = vld [vmem:[%s1338_s21 + $0x10] sm:$0xff] }
  0x1c   : > { %v1103_v25 = vld [vmem:[%s1535_s6 + $0x20] sm:$0xff]   ;;  %v419_v27 = vpack.c.bf16 %v412_v26, %v411_v24  ;;  %v414_v29 = vld [vmem:[%s1338_s21 + $0x18] sm:$0xff]  ;;  %v416_v32 = vld [vmem:[%s1338_s21 + $0x28] sm:$0xff] }
  0x1d   : > { %524 = vmatpush1.bf16.msra.mxu0 %v1080_v6  ;;  %992 = vmatpush3.bf16.msra.mxu1 %v1099_v15  ;;  %v420_v30 = vpack.c.bf16 %v414_v29, %v413_v28  ;;  %v415_v31 = vld [vmem:[%s1338_s21 + $0x20] sm:$0xff]  ;;  %v417_v34 = vld [vmem:[%s1338_s21 + $0x30] sm:$0xff]  ;;  %v418_v35 = vld [vmem:[%s1338_s21 + $0x38] sm:$0xff]  ;;  %v1179_v29 = vmov 1966171168   ;;  %s1180_s21 = smov [#allocation2]  }
  0x1e   : > { %525 = vmatprep.subr.bf16.mxu0 %v1081_v7  ;;  %993 = vmatprep.subr.bf16.mxu1 %v1100_v16  ;;  %v421_v33 = vpack.c.bf16 %v416_v32, %v415_v31  ;;  %v422_v36 = vpack.c.bf16 %v418_v35, %v417_v34  ;;  %v1104_v37 = vld [vmem:[%s1535_s6 + $0x58] sm:$0xff]   ;;  %v1106_v39 = vld [vmem:[%s1535_s6 + $0x50] sm:$0xff]   ;;  %v1108_v41 = vld [vmem:[%s1535_s6 + $0x48] sm:$0xff]   ;;  %v365_v31 = vlaneseq  ;;  %s1120_s23 = sshll.u32 %s1180_s21, 4  ;;  %s1121_s23 = int_to_ptr.vmem [resolvable:$false] %s1120_s23 }
  0x1f   : > { %v1105_v38 = vld [vmem:[%s1535_s6 + $0x18] sm:$0xff]   ;;  %v1107_v40 = vld [vmem:[%s1535_s6 + $0x10] sm:$0xff]   ;;  %v1109_v42 = vld [vmem:[%s1535_s6 + $0x8] sm:$0xff]   ;;  %s1122_s18 = scalar_lea.vmem %s1121_s23, 2048  ;;  %p1123_p0 = scmp.lt.s32.totalorder %s1484_s24, %s1121_s23 }
  0x20   : > { %v1110_v43 = vld [vmem:[%s1535_s6 + $0x40] sm:$0xff]   ;;  %v310_v46 = vld [vmem:[%s1531_s2 + $0x10] sm:$0xff]  ;;  %v309_v47 = vld [vmem:[%s1531_s2 + $0x8] sm:$0xff]  ;;  %v366_v34 = vshrl.u32 %v365_v31, 7  ;;  %p1124_p1 = scmp.lt.s32.totalorder %s1122_s18, %s1116_s9 }
  0x21   : > { %526 = vmatpush1.bf16.msra.mxu0 %v1083_v8  ;;  %994 = vmatpush3.bf16.msra.mxu1 %v1101_v19  ;;  %v1111_v44 = vld [vmem:[%s1535_s6] sm:$0xff]   ;;  %v311_v48 = vld [vmem:[%s1531_s2 + $0x18] sm:$0xff]  ;;  %v328_v52 = vld [vmem:[%s1532_s3 + $0x10] sm:$0xff] }
  0x22   : > { %527 = vmatprep.subr.bf16.mxu0 %v1084_v9  ;;  %995 = vmatprep.subr.bf16.mxu1 %v1102_v20  ;;  %v308_v45 = vld [vmem:[%s1531_s2] sm:$0xff]  ;;  %v319_v50 = vadd.f32 %v311_v48, %v309_v47  ;;  %v327_v53 = vld [vmem:[%s1532_s3 + $0x8] sm:$0xff]  ;;  %v329_v54 = vld [vmem:[%s1532_s3 + $0x18] sm:$0xff]  ;;  %p1125_p2 = por %p1124_p1, %p1123_p0 }
  0x23   : > { %v312_v49 = vadd.f32 %v310_v46, %v308_v45  ;;  %v326_v51 = vld [vmem:[%s1532_s3] sm:$0xff]  ;;  %v337_v58 = vadd.f32 %v329_v54, %v327_v53 }
  0x24   : > { %v330_v56 = vadd.f32 %v328_v52, %v326_v51  ;;  %v320_v57 = vrot.slane %v319_v50, 4  ;;  %v378_v51 = vld [vmem:[%s1534_s5] sm:$0x3]  ;;  %p1126_p3 = pnand %p1125_p2, %p1119_p13 }
  0x25   : > { %528 = vmatpush1.bf16.msra.mxu0 %v1086_v10  ;;  %996 = vmatpush3.bf16.msra.mxu1 %v1103_v25  ;;  %v313_v55 = vrot.slane %v312_v49, 4  ;;  %v338_v62 = vrot.slane %v337_v58, 4 }
  0x26   : > { %529 = vmatprep.subr.bf16.mxu0 %v1087_v11  ;;  %997 = vmatprep.subr.bf16.mxu1 %v1104_v37  ;;  %v331_v60 = vrot.slane %v330_v56, 4  ;;  %v321_v61 = vadd.f32 %v320_v57, %v319_v50 }
  0x27   : > { %v314_v59 = vadd.f32 %v313_v55, %v312_v49 }
  0x28   : > { %v332_v0 = vadd.f32 %v331_v60, %v330_v56  ;;  %v322_v1 = vrot.slane %v321_v61, 2 }
  0x29   : > { %530 = vmatpush1.bf16.msra.mxu0 %v1089_v17  ;;  %998 = vmatpush3.bf16.msra.mxu1 %v1105_v38  ;;  %v315_v63 = vrot.slane %v314_v59, 2 }
  0x2a   : > { %531 = vmatprep.subr.bf16.mxu0 %v1090_v18  ;;  %999 = vmatprep.subr.bf16.mxu1 %v1106_v39  ;;  %v333_v4 = vrot.slane %v332_v0, 2  ;;  %v323_v5 = vadd.f32 %v322_v1, %v321_v61 }
  0x2b   : > { %v316_v3 = vadd.f32 %v315_v63, %v314_v59 }
  0x2c   : > { %v334_v8 = vadd.f32 %v333_v4, %v332_v0  ;;  %v324_v9 = vrot.slane %v323_v5, 1 }
  0x2d   : > { %532 = vmatpush1.bf16.msra.mxu0 %v1092_v21  ;;  %1000 = vmatpush3.bf16.msra.mxu1 %v1107_v40  ;;  %v317_v7 = vrot.slane %v316_v3, 1  ;;  %v354_v40 = vld [vmem:[%s1533_s4] sm:$0x3] }
  0x2e   : > { %533 = vmatprep.subr.bf16.mxu0 %v1093_v22  ;;  %1001 = vmatprep.subr.bf16.mxu1 %v1108_v41  ;;  %v335_v12 = vrot.slane %v334_v8, 1  ;;  %v325_v13 = vadd.f32 %v324_v9, %v323_v5 }
  0x2f   : > { %v318_v11 = vadd.f32 %v317_v7, %v316_v3 }
  0x30   : > { %v336_v15 = vadd.f32 %v335_v12, %v334_v8  ;;  %v345_v18 = vmul.f32 0.00390625, %v325_v13 }
  0x31   : > { %534 = vmatpush1.bf16.msra.mxu0 %v1095_v23  ;;  %1002 = vmatpush3.bf16.msra.mxu1 %v1109_v42  ;;  %v344_v16 = vmul.f32 0.00390625, %v318_v11  ;;  %v382_v42 = vsub.s32 0, %v366_v34 }
  0x32   : > { %1003 = vmatprep.subr.bf16.mxu1 %v1110_v43  ;;  %v346_v19 = vmul.f32 0.00390625, %v336_v15  ;;  %v349_v22 = vmul.f32 %v345_v18, %v345_v18  ;;  %v386_v43 = vsub.s32 1, %v366_v34 }
  0x33   : > { %v348_v20 = vmul.f32 %v344_v16, %v344_v16 }
  0x34   : > { %552 = vmatmul.mubr.bf16.vlgmr.msra.gmra.mxu0 %v419_v27 }
  0x35   : > { %561 = vmatprep.mubr.bf16.mxu0 %v1178_v2  ;;  %1004 = vmatpush3.bf16.msra.mxu1 %v1111_v44  ;;  %v350_v23 = vsub.f32 %v346_v19, %v348_v20 }
  0x37   : > { %v352_v25 = vmax.f32 %v350_v23, 0.0 }
  0x39   : > { %v355_v27 = vadd.f32 1e-05, %v352_v25 }
  0x3b   : > { %1112 = vrsqrt.f32 %v355_v27 }
  0x3c   : > { %562 = vmatmul.mubr.bf16.gmra.mxu0 %v420_v30  ;;  %v363_v30 = vunpack.c.l.s4 %v1179_v29 }
  0x3d   : > { %571 = vmatprep.mubr.bf16.mxu0 %v1178_v2 }
  0x44   : > { %572 = vmatmul.mubr.bf16.gmra.mxu0 %v421_v33  ;;  %v364_v33 = vunpack.c.0.s8 %v363_v30 }
  0x45   : > { %581 = vmatprep.mubr.bf16.mxu0 %v1178_v2  ;;  %v339_v2 = vadd.f32 %v338_v62, %v337_v58 }
  0x46   : > { %v367_v37 = vsub.s32 %v364_v33, %v366_v34 }
  0x47   : > { %v340_v6 = vrot.slane %v339_v2, 2 }
  0x48   : > { %v1113_v32 = vpop.eup %1112 }
  0x49   : > { %v341_v10 = vadd.f32 %v340_v6, %v339_v2 }
  0x4b   : > { %v342_v14 = vrot.slane %v341_v10, 1 }
  0x4c   : > { %582 = vmatmul.mubr.bf16.gmra.mxu0 %v422_v36 }
  0x4d   : > { %v343_v17 = vadd.f32 %v342_v14, %v341_v10 }
  0x4f   : > { %v347_v21 = vmul.f32 0.00390625, %v343_v17 }
  0x51   : > { %v351_v24 = vsub.f32 %v347_v21, %v349_v22 }
  0x53   : > { %v353_v26 = vmax.f32 %v351_v24, 0.0 }
  0x55   : > { %v356_v28 = vadd.f32 1e-05, %v353_v26 }
  0x57   : > { %1114 = vrsqrt.f32 %v356_v28 }
  0x64   : > { %v1115_v35 = vpop.eup %1114 }
  0x65   : > { %v361_v36 = vcombine.low %v1113_v32, %v1115_v35 }
  0x67   : > { %v368_v38 = vrot.slane %v361_v36, %v367_v37 }
  0x69   : > { %v375_v39 = vrot.slane %v368_v38, %v367_v37 }
  0x6b   : > { %v377_v41 = vmul.f32 %v375_v39, %v354_v40 }
  0x6d   : > { %v1417_v44 = vrot.slane %v377_v41, %v382_v42  ;;  %v1419_v45 = vrot.slane %v377_v41, %v386_v43 }
  0x6f   : > { %v390_v46 = vmul.f32 %v1417_v44, %v344_v16  ;;  %v391_v47 = vmul.f32 %v1419_v45, %v345_v18 }
  0x71   : > { %v394_v48 = vcombine.low %v390_v46, %v391_v47 }
  0x73   : > { %v401_v49 = vrot.slane %v394_v48, %v367_v37 }
  0x75   : > { %v408_v50 = vrot.slane %v401_v49, %v367_v37 }
  0x77   : > { %v410_v52 = vsub.f32 %v378_v51, %v408_v50 }
  0x79   : > { %v1427_v56 = vrot.slane %v410_v52, %v386_v43  ;;  %v1430_v58 = vrot.slane %v410_v52, %v382_v42 }
  0xf4   : > { %v553_v53 = vpop.f32.mrf.mxu0 }
  0xf5   : > { %v592_v57 = vmul.f32 %v553_v53, %v1417_v44 }
  0xf6   : > { %v555_v54 = vpop.f32.mrf.mxu0 }
  0xf7   : > { %v593_v55 = vmul.f32 %v555_v54, %v1419_v45  ;;  %v619_v1 = vadd.f32 %v1430_v58, %v592_v57 }
  0xf8   : > { %v557_v59 = vpop.f32.mrf.mxu0 }
  0xf9   : > { %v594_v60 = vmul.f32 %v557_v59, %v1417_v44  ;;  %v620_v0 = vadd.f32 %v1427_v56, %v593_v55  ;;  %v635_v9 = vmax.f32 %v619_v1, 0.0 }
  0xfa   : > { %v559_v61 = vpop.f32.mrf.mxu0 }
  0xfb   : > { %v621_v62 = vadd.f32 %v1430_v58, %v594_v60  ;;  %v595_v63 = vmul.f32 %v559_v61, %v1419_v45  ;;  %v636_v7 = vmax.f32 %v620_v0, 0.0 }
  0xfc   : > { %v563_v2 = vpop.f32.mrf.mxu0 }
  0xfd   : > { %v622_v3 = vadd.f32 %v1427_v56, %v595_v63  ;;  %v637_v4 = vmax.f32 %v621_v62, 0.0  ;;  %v596_v10 = vmul.f32 %v563_v2, %v1417_v44 }
  0xfe   : > { %v565_v5 = vpop.f32.mrf.mxu0 }
  0xff   : > { %v597_v6 = vmul.f32 %v565_v5, %v1419_v45  ;;  %v638_v8 = vmax.f32 %v622_v3, 0.0  ;;  %v651_v15 = vpack.c.bf16 %v637_v4, %v635_v9  ;;  %v623_v19 = vadd.f32 %v1430_v58, %v596_v10 }
 0x100   : > { %v567_v11 = vpop.f32.mrf.mxu0 }
 0x101   : > { %v598_v12 = vmul.f32 %v567_v11, %v1417_v44  ;;  %v652_v13 = vpack.c.bf16 %v638_v8, %v636_v7  ;;  %v624_v16 = vadd.f32 %v1427_v56, %v597_v6  ;;  %v639_v27 = vmax.f32 %v623_v19, 0.0 }
 0x102   : > { %v569_v14 = vpop.f32.mrf.mxu0 }
 0x103   : > { %v625_v17 = vadd.f32 %v1430_v58, %v598_v12  ;;  %v599_v18 = vmul.f32 %v569_v14, %v1419_v45  ;;  %826 = vmatprep.mubr.bf16.mxu1 %v652_v13  ;;  %v640_v24 = vmax.f32 %v624_v16, 0.0 }
 0x104   : > { %v573_v20 = vpop.f32.mrf.mxu0  ;;  %827 = vmatmul.mubr.bf16.vlgmr.msra.gmra.mxu1 %v651_v15 }
 0x105   : > { %v626_v21 = vadd.f32 %v1427_v56, %v599_v18  ;;  %v641_v22 = vmax.f32 %v625_v17, 0.0  ;;  %v600_v28 = vmul.f32 %v573_v20, %v1417_v44 }
 0x106   : > { %v575_v23 = vpop.f32.mrf.mxu0 }
 0x107   : > { %v642_v25 = vmax.f32 %v626_v21, 0.0  ;;  %v601_v26 = vmul.f32 %v575_v23, %v1419_v45  ;;  %v653_v33 = vpack.c.bf16 %v641_v22, %v639_v27  ;;  %v627_v37 = vadd.f32 %v1430_v58, %v600_v28 }
 0x108   : > { %v577_v29 = vpop.f32.mrf.mxu0 }
 0x109   : > { %v602_v30 = vmul.f32 %v577_v29, %v1417_v44  ;;  %v654_v31 = vpack.c.bf16 %v642_v25, %v640_v24  ;;  %v628_v34 = vadd.f32 %v1427_v56, %v601_v26  ;;  %v643_v47 = vmax.f32 %v627_v37, 0.0 }
 0x10a   : > { %v579_v32 = vpop.f32.mrf.mxu0 }
 0x10b   : > { %v629_v35 = vadd.f32 %v1430_v58, %v602_v30  ;;  %v603_v36 = vmul.f32 %v579_v32, %v1419_v45  ;;  %834 = vmatprep.mubr.bf16.mxu1 %v654_v31  ;;  %v644_v42 = vmax.f32 %v628_v34, 0.0 }
 0x10c   : > { %v583_v38 = vpop.f32.mrf.mxu0  ;;  %835 = vmatmul.mubr.bf16.gmra.mxu1 %v653_v33 }
 0x10d   : > { %v630_v39 = vadd.f32 %v1427_v56, %v603_v36  ;;  %v645_v40 = vmax.f32 %v629_v35, 0.0  ;;  %v604_v48 = vmul.f32 %v583_v38, %v1417_v44 }
 0x10e   : > { %v585_v41 = vpop.f32.mrf.mxu0 }
 0x10f   : > { %v646_v43 = vmax.f32 %v630_v39, 0.0  ;;  %v605_v46 = vmul.f32 %v585_v41, %v1419_v45  ;;  %v655_v53 = vpack.c.bf16 %v645_v40, %v643_v47  ;;  %v631_v59 = vadd.f32 %v1430_v58, %v604_v48 }
 0x110   : > { %v587_v49 = vpop.f32.mrf.mxu0 }
 0x111   : > { %v606_v50 = vmul.f32 %v587_v49, %v1417_v44  ;;  %v656_v51 = vpack.c.bf16 %v646_v43, %v644_v42  ;;  %v632_v54 = vadd.f32 %v1427_v56, %v605_v46  ;;  %v647_v63 = vmax.f32 %v631_v59, 0.0 }
 0x112   : > { %v589_v52 = vpop.f32.mrf.mxu0 }
 0x113   : > { %v633_v55 = vadd.f32 %v1430_v58, %v606_v50  ;;  %v607_v57 = vmul.f32 %v589_v52, %v1419_v45  ;;  %842 = vmatprep.mubr.bf16.mxu1 %v656_v51  ;;  %v648_v62 = vmax.f32 %v632_v54, 0.0  ;;  %v966_v45 = vld [vmem:[%s1536_s7] ss:$0 sm:$0xff] }
 0x114   : > { %843 = vmatmul.mubr.bf16.gmra.mxu1 %v655_v53 }
 0x115   : > { %v634_v60 = vadd.f32 %v1427_v56, %v607_v57  ;;  %v649_v61 = vmax.f32 %v633_v55, 0.0 }
 0x117   : > { %v650_v44 = vmax.f32 %v634_v60, 0.0  ;;  %v657_v1 = vpack.c.bf16 %v649_v61, %v647_v63 }
 0x119   : > { %v658_v0 = vpack.c.bf16 %v650_v44, %v648_v62 }
 0x11b   : > { %850 = vmatprep.mubr.bf16.mxu1 %v658_v0 }
 0x11c   : > { %851 = vmatmul.mubr.bf16.gmra.mxu1 %v657_v1 }
 0x1c4   : > { %v1005_v2 = vpop.f32.mrf.mxu1 }
 0x1c6   : > { %v1006_v58 = vpop.f32.mrf.mxu1 }
 0x1c7   : > { %v1007_v3 = vadd.f32 %v1006_v58, %v1005_v2 }
 0x1c8   : > { %v1008_v4 = vpop.f32.mrf.mxu1 }
 0x1c9   : > { %v829_v56 = vadd.f32 %v1007_v3, %v966_v45 }
 0x1ca   : > { %v1009_v5 = vpop.f32.mrf.mxu1 }
 0x1cb   : > { %859 = vst [vmem:[%s1468_s20] sm:$0xff] %v829_v56  ;;  %v1010_v6 = vadd.f32 %v1009_v5, %v1008_v4 }
 0x1cc   : > { %v1011_v7 = vpop.f32.mrf.mxu1 }
 0x1cd   : > { %v832_v8 = vadd.f32 %v1010_v6, %v966_v45 }
 0x1ce   : > { %v1012_v9 = vpop.f32.mrf.mxu1 }
 0x1cf   : > { %860 = vst [vmem:[%s1468_s20 + $0x8] sm:$0xff] %v832_v8  ;;  %v1013_v10 = vadd.f32 %v1012_v9, %v1011_v7 }
 0x1d0   : > { %v1014_v11 = vpop.f32.mrf.mxu1 }
 0x1d1   : > { %v837_v12 = vadd.f32 %v1013_v10, %v966_v45 }
 0x1d2   : > { %v1015_v13 = vpop.f32.mrf.mxu1 }
 0x1d3   : > { %861 = vst [vmem:[%s1468_s20 + $0x10] sm:$0xff] %v837_v12  ;;  %v1016_v14 = vadd.f32 %v1015_v13, %v1014_v11 }
 0x1d4   : > { %v1017_v15 = vpop.f32.mrf.mxu1 }
 0x1d5   : > { %v840_v16 = vadd.f32 %v1016_v14, %v966_v45 }
 0x1d6   : > { %v1018_v17 = vpop.f32.mrf.mxu1 }
 0x1d7   : > { %862 = vst [vmem:[%s1468_s20 + $0x18] sm:$0xff] %v840_v16  ;;  %v1019_v18 = vadd.f32 %v1018_v17, %v1017_v15 }
 0x1d8   : > { %v1020_v19 = vpop.f32.mrf.mxu1 }
 0x1d9   : > { %v845_v20 = vadd.f32 %v1019_v18, %v966_v45 }
 0x1da   : > { %v1021_v21 = vpop.f32.mrf.mxu1 }
 0x1db   : > { %863 = vst [vmem:[%s1468_s20 + $0x20] sm:$0xff] %v845_v20  ;;  %v1022_v22 = vadd.f32 %v1021_v21, %v1020_v19 }
 0x1dc   : > { %v1023_v23 = vpop.f32.mrf.mxu1 }
 0x1dd   : > { %v848_v24 = vadd.f32 %v1022_v22, %v966_v45 }
 0x1de   : > { %v1024_v25 = vpop.f32.mrf.mxu1 }
 0x1df   : > { %864 = vst [vmem:[%s1468_s20 + $0x28] sm:$0xff] %v848_v24  ;;  %v1025_v26 = vadd.f32 %v1024_v25, %v1023_v23 }
 0x1e0   : > { %v1026_v27 = vpop.f32.mrf.mxu1 }
 0x1e1   : > { %v853_v28 = vadd.f32 %v1025_v26, %v966_v45 }
 0x1e2   : > { %v1027_v29 = vpop.f32.mrf.mxu1 }
 0x1e3   : > { %865 = vst [vmem:[%s1468_s20 + $0x30] sm:$0xff] %v853_v28  ;;  %v1028_v30 = vadd.f32 %v1027_v29, %v1026_v27 }
 0x1e5   : > { %v856_v31 = vadd.f32 %v1028_v30, %v966_v45 }
 0x1e7   : > { %866 = vst [vmem:[%s1468_s20 + $0x38] sm:$0xff] %v856_v31 }
 0x1e8   : > { %1129 = shalt.err (!%p1126_p3)
}
 0x1e9   : > { %s1130_s17 = scalar_lea.hbm %s1482_s10, 1024  ;;  %s1134_s20 = scalar_lea.hbm %s1537_s8, 4096 }
 0x1ea   : > { %p1131_p4 = scmp.ne.s32.totalorder %s1482_s10, %s1130_s17  ;;  %p1135_p9 = scmp.lt.s32.totalorder %s1482_s10, %s1537_s8 }
 0x1eb   : > { %p1136_p10 = scmp.lt.s32.totalorder %s1134_s20, %s1130_s17 }
 0x1ec   : > { %p1132_p7 = pnand %p1131_p4, %p1266_p5 }
 0x1ed   : > { %p1137_p11 = por %p1136_p10, %p1135_p9 }
 0x1ee   : > { %p1133_p8 = pneg %p1132_p7 }
 0x1f0   : > { %p1138_p12 = pnand %p1137_p11, %p1133_p8 }
 0x1f2   : > { %1141 = shalt.err (!%p1138_p12)
}
 0x1f3   : > { %s1181_s26 = smov 128   ;;  %s1182_s9 = smov 8  }
 0x1f4   : > { %1029 = dma.vmem_to_hbm [thread:$0]  (%p1266_p5), %s1484_s24, 1024, %s1482_s10, %s1489_s12, %s1181_s26, %s1181_s26, %s1182_s9  }
 0x1f5 PF: > { %p1035_p13 = scmp.ge.s32.totalorder %s1176_s30, 2  ;;  %s896_s21 = sand.u32 1, %s1164_s27  }
 0x1f6   : > { %s897_s23 = scalar_lea.sflag [#allocation3], %s896_s21 }
 0x1f7   : > { %p1032_p0 = pnand %p1035_p13, %p1270_p6 }
 0x1f9   : > { %p1033_p1 = pneg %p1032_p0 }
 0x1fb   : > { %1159 = dma.done.wait (%p1033_p1), %s897_s23, 1024  }
 0x1fc   : > { %1161 = vsyncadd (%p1033_p1), %s897_s23, 4294966272  ;;  %p18_p2 = scmp.ge.s32.totalorder %s1253_s11, 6   ;;  %s1540_s27 = smov %s1168_s28 }
 0x1fd   : > { %s1541_s28 = smov %s1172_s29  ;;  %s1542_s29 = smov %s1264_s14 }
 0x1fe   : > { %s1543_s30 = smov %s1253_s11  ;;  %20 = sbr.rel (!%p18_p2) target bundleno = 3 (0x3), region = 87 }
 0x203   :  { %902 = vsyncpa [#allocation3], 1 }
 0x204   :  { %904 = vsyncpa [#allocation3 + $0x1], 1 }

</bundles_post_ra>
